<compile_context>
chip_gen: v7x
topology: tpu7x:2x2x1
jax: 0.10.0
libtpu: 0.0.40
codegen_flags: <defaults>
</compile_context>

<pallas_src>
import functools

import jax
import jax.numpy as jnp
from jax.experimental import pallas as pl
from jax.experimental.pallas import tpu as pltpu

_NEG_BIG = -1e30  # masked-edge sentinel; must stay in f32 math


def _round_up(x, m):
    return (x + m - 1) // m * m


def _gat_attn_kernel(wh1_ref, wh2_ref, adj_ref, wh_ref, out_ref,
                     m_ref, l_ref, acc_ref, *, leaky_alpha, concat):
    """One (row-tile, col-tile) step of masked online-softmax attention."""
    k = pl.program_id(1)

    @pl.when(k == 0)
    def _init():
        m_ref[...] = jnp.full_like(m_ref, _NEG_BIG)
        l_ref[...] = jnp.zeros_like(l_ref)
        acc_ref[...] = jnp.zeros_like(acc_ref)

    # --- scores for this (TM, TK) block, all f32 ---
    adj_f = adj_ref[...].astype(jnp.float32)           # int8 -> f32 once
    e = wh1_ref[...] + wh2_ref[...]                     # [TM,1] + [1,TK]
    e = jnp.maximum(e, leaky_alpha * e)                 # LeakyReLU (alpha < 1)
    e = jnp.where(adj_f > 0.0, e, _NEG_BIG)             # mask absent edges

    # --- online softmax update ---
    m_prev = m_ref[...]
    m_new = jnp.maximum(m_prev, jnp.max(e, axis=1, keepdims=True))
    corr = jnp.exp(m_prev - m_new)                      # finite (sentinel, not -inf)
    # Masked entries give exp(0)=1 when the whole prefix is masked and 0
    # otherwise; the adj_f multiply zeroes both cases explicitly.
    p = jnp.exp(e - m_new) * adj_f                      # [TM, TK] f32

    l_ref[...] = corr * l_ref[...] + jnp.sum(p, axis=1, keepdims=True)
    pv = jnp.dot(p.astype(jnp.bfloat16), wh_ref[...],   # wh_ref already bf16
                 preferred_element_type=jnp.float32)    # MXU bf16xbf16 -> f32
    acc_ref[...] = corr * acc_ref[...] + pv
    m_ref[...] = m_new

    @pl.when(k == pl.num_programs(1) - 1)
    def _finalize():
        l = l_ref[...]
        inv = jnp.where(l > 0.0, 1.0 / l, 0.0)          # edgeless rows -> zeros
        hp = acc_ref[...] * inv
        if concat:
            hp = jnp.where(hp > 0.0, hp, jnp.exp(hp) - 1.0)   # ELU
        out_ref[...] = hp.astype(out_ref.dtype)


def graph_attention_layer(h, edge_index, W, a, *, nnode, out_features,
                          alpha=0.2, concat=True, row_tile=256, col_tile=512):
    """JAX/Pallas equivalent of GraphAttentionLayer.forward(h, edge_index)."""
    N = int(nnode)
    Fout = int(out_features)
    f32 = jnp.float32
    HIGH = jax.lax.Precision.HIGHEST

    h = h.astype(f32)
    W = W.astype(f32)
    a = a.astype(f32)

    # --- hoisted projections (O(N*F), wrapper-side XLA). Pinned to full-f32
    #     precision: scores feed an exp(), so default-precision dots here would
    #     introduce O(1e-3) attention error. ---
    Wh = jnp.dot(h, W, precision=HIGH)                    # [N, Fout]
    Wh1 = jnp.dot(Wh, a[:Fout, :], precision=HIGH)        # [N, 1]  row scores
    Wh2 = jnp.dot(Wh, a[Fout:, :], precision=HIGH).T      # [1, N]  col scores

    # --- dense int8 adjacency mask from COO edge_index (plain-JAX glue) ---
    # TODO(synk): cache this for static graphs; a CSR + scalar-prefetch
    # block-skip variant would avoid the O(N^2) mask for very sparse graphs.
    adj = jnp.zeros((N, N), jnp.int8).at[edge_index[0], edge_index[1]].set(1)

    # --- tiling: row tiles multiples of 32 (int8-friendly sublane packing),
    #     col tiles multiples of 128 (lane aligned) ---
    row_tile = _round_up(row_tile, 32)
    col_tile = _round_up(col_tile, 128)
    TM = min(row_tile, _round_up(N, 32))
    if _round_up(N, TM) // TM < 2 and TM >= 64:
        TM = _round_up(TM // 2, 32)        # v7x: >=2 row tiles for both TCs
    Nr = _round_up(N, TM)
    TK = min(col_tile, _round_up(N, 128))
    Nc = _round_up(N, TK)
    F_pad = _round_up(Fout, 128)           # lane-dense output stores

    Wh1_p = jnp.zeros((Nr, 1), f32).at[:N, :].set(Wh1)
    Wh2_p = jnp.zeros((1, Nc), f32).at[:, :N].set(Wh2)
    adj_p = jnp.zeros((Nr, Nc), jnp.int8).at[:N, :N].set(adj)
    # Wh is stored bf16 in HBM (MXU operand); scores above used the f32 Wh.
    Wh_p = jnp.zeros((Nc, F_pad), jnp.bfloat16).at[:N, :Fout].set(
        Wh.astype(jnp.bfloat16))

    kernel = functools.partial(_gat_attn_kernel, leaky_alpha=float(alpha),
                               concat=bool(concat))

    # Explicit VMEM budget: double-buffered streamed tiles + scratch + f32
    # temporaries, with headroom; clamped to a safe range for v5e..v7x.
    est = (2 * (TM * TK + TK * F_pad * 2 + TM * 4 + TK * 4 + TM * F_pad * 4)
           + TM * F_pad * 4 + 2 * TM * 4 + 8 * TM * TK * 4)
    vmem_limit = int(min(max(2 * est, 16 * 1024 * 1024), 48 * 1024 * 1024))

    grid = (Nr // TM, Nc // TK)            # reduction (K) axis last
    out = pl.pallas_call(
        kernel,
        out_shape=jax.ShapeDtypeStruct((Nr, F_pad), f32),
        grid_spec=pltpu.PrefetchScalarGridSpec(
            num_scalar_prefetch=0,
            grid=grid,
            in_specs=[
                pl.BlockSpec((TM, 1), lambda i, k: (i, 0)),       # Wh1 rows
                pl.BlockSpec((1, TK), lambda i, k: (0, k)),       # Wh2 cols
                pl.BlockSpec((TM, TK), lambda i, k: (i, k)),      # adj (int8)
                pl.BlockSpec((TK, F_pad), lambda i, k: (k, 0)),   # Wh (bf16)
            ],
            out_specs=pl.BlockSpec((TM, F_pad), lambda i, k: (i, 0)),
            scratch_shapes=[
                pltpu.VMEM((TM, 1), f32),        # running max m
                pltpu.VMEM((TM, 1), f32),        # running denom l
                pltpu.VMEM((TM, F_pad), f32),    # running numerator acc
            ],
        ),
        compiler_params=pltpu.CompilerParams(
            dimension_semantics=("parallel", "arbitrary"),
            vmem_limit_bytes=vmem_limit),
    )(Wh1_p, Wh2_p, adj_p, Wh_p)

    return out[:N, :Fout]


def _reference(h, edge_index, W, a, *, nnode, out_features, alpha, concat):
    """Pure-JAX, full-f32 reference of the PyTorch forward."""
    HIGH = jax.lax.Precision.HIGHEST
    Fout = out_features
    Wh = jnp.dot(h, W, precision=HIGH)
    Wh1 = jnp.dot(Wh, a[:Fout, :], precision=HIGH)
    Wh2 = jnp.dot(Wh, a[Fout:, :], precision=HIGH)
    e = Wh1 + Wh2.T
    e = jnp.where(e > 0, e, alpha * e)
    adj = jnp.zeros((nnode, nnode), bool).at[edge_index[0], edge_index[1]].set(True)
    e = jnp.where(adj, e, -1e30)
    m = jnp.max(e, axis=1, keepdims=True)
    p = jnp.where(adj, jnp.exp(e - m), 0.0)
    d = jnp.sum(p, axis=1, keepdims=True)
    attn = p / jnp.where(d > 0, d, 1.0)
    hp = jnp.dot(attn, Wh, precision=HIGH)
    if concat:
        hp = jnp.where(hp > 0, hp, jnp.exp(hp) - 1.0)
    return hp


def _xavier_uniform(key, shape, gain):
    fan_in, fan_out = shape[0], shape[1]
    bound = gain * jnp.sqrt(6.0 / (fan_in + fan_out))
    return jax.random.uniform(key, shape, jnp.float32, -bound, bound)


def _make_edges(nnode):
    # Self-loop + ring + skip edge for every node except the last one, which
    # is left with NO outgoing edges to exercise the edgeless-row path of
    # torch.sparse.softmax (all-zero output row).
    src, dst = [], []
    for i in range(nnode - 1):
        for j in (i, (i + 1) % nnode, (i + 3) % nnode):
            src.append(i)
            dst.append(j)
    return jnp.array([src, dst], dtype=jnp.int32)


if __name__ == "__main__":
    in_features = 16
    out_features = 32
    alpha = 0.2

    key = jax.random.PRNGKey(0)
    k_h1, k_h2, k_w, k_a = jax.random.split(key, 4)

    W = _xavier_uniform(k_w, (in_features, out_features), gain=1.414)
    a = _xavier_uniform(k_a, (2 * out_features, 1), gain=1.414)

    # Tolerance: the only reduced-precision path is the in-kernel bf16 MXU
    # matmul; |err| <~ 2 * max|Wh| * 2^-9 ~= 2e-2 worst case at this scale.
    tol = 3e-2

    # Config 1: tiny graph (single-tile path).  Config 2: larger graph with a
    # smaller col_tile so the multi-step online-softmax / multi-row-tile path
    # is exercised (grid 2x2).
    configs = [(12, 512), (200, 128)]
    for nnode, col_tile in configs:
        k_h = k_h1 if nnode == 12 else k_h2
        h = jax.random.normal(k_h, (nnode, in_features), dtype=jnp.float32)
        edge_index = _make_edges(nnode)
        for concat in (True, False):
            out = graph_attention_layer(h, edge_index, W, a, nnode=nnode,
                                        out_features=out_features, alpha=alpha,
                                        concat=concat, col_tile=col_tile)
            jax.block_until_ready(out)
            ref = _reference(h, edge_index, W, a, nnode=nnode,
                             out_features=out_features, alpha=alpha,
                             concat=concat)
            assert out.shape == (nnode, out_features)
            assert bool(jnp.all(jnp.isfinite(out)))
            assert bool(jnp.all(out[nnode - 1] == 0.0))   # edgeless row -> zeros
            err = float(jnp.max(jnp.abs(out - ref)))
            assert err < tol, f"N={nnode} concat={concat}: err {err:.3e} >= {tol}"

    print("KERNEL_OK")
</pallas_src>

<mosaic_0001>
module attributes {stable_mosaic.version = 11 : i64} {
  func.func @_gat_attn_kernel(%arg0: i32, %arg1: i32, %arg2: memref<32x1xf32, #tpu.memory_space<vmem>>, %arg3: memref<1x128xf32, #tpu.memory_space<vmem>>, %arg4: memref<32x128xi8, #tpu.memory_space<vmem>>, %arg5: memref<128x128xbf16, #tpu.memory_space<vmem>>, %arg6: memref<32x128xf32, #tpu.memory_space<vmem>>, %arg7: memref<32x1xf32, #tpu.memory_space<vmem>>, %arg8: memref<32x1xf32, #tpu.memory_space<vmem>>, %arg9: memref<32x128xf32, #tpu.memory_space<vmem>>) attributes {dimension_semantics = [#tpu.dimension_semantics<parallel>, #tpu.dimension_semantics<arbitrary>], iteration_bounds = array<i64: 1, 1>, scalar_prefetch = 0 : i64, scratch_operands = 3 : i64, tpu.core_type = #tpu.core_type<tc>, window_params = [{transform_indices = @transform_0, window_bounds = array<i64: 32, 1>}, {transform_indices = @transform_1, window_bounds = array<i64: 1, 128>}, {transform_indices = @transform_2, window_bounds = array<i64: 32, 128>}, {transform_indices = @transform_3, window_bounds = array<i64: 128, 128>}, {transform_indices = @transform_4, window_bounds = array<i64: 32, 128>}]} {
    %c0_i32 = arith.constant 0 : i32
    %0 = arith.cmpi eq, %arg1, %c0_i32 : i32
    %1 = arith.extui %0 : i1 to i32
    %c0_i32_0 = arith.constant 0 : i32
    %2 = arith.cmpi ne, %1, %c0_i32_0 : i32
    scf.if %2 {
      %cst_27 = arith.constant -1.000000e+30 : f32
      %45 = vector.broadcast %cst_27 : f32 to vector<32x1xf32>
      %c0_28 = arith.constant 0 : index
      %c0_29 = arith.constant 0 : index
      %46 = vector.load %arg7[%c0_28, %c0_29] : memref<32x1xf32, #tpu.memory_space<vmem>>, vector<32x1xf32>
      tpu.vector_store %arg7[%c0_28, %c0_29], %45 {strides = array<i32>} : memref<32x1xf32, #tpu.memory_space<vmem>>, vector<32x1xf32>,
      %cst_30 = arith.constant 0.000000e+00 : f32
      %47 = vector.broadcast %cst_30 : f32 to vector<32x1xf32>
      %c0_31 = arith.constant 0 : index
      %c0_32 = arith.constant 0 : index
      %48 = vector.load %arg8[%c0_31, %c0_32] : memref<32x1xf32, #tpu.memory_space<vmem>>, vector<32x1xf32>
      tpu.vector_store %arg8[%c0_31, %c0_32], %47 {strides = array<i32>} : memref<32x1xf32, #tpu.memory_space<vmem>>, vector<32x1xf32>,
      %cst_33 = arith.constant 0.000000e+00 : f32
      %49 = vector.broadcast %cst_33 : f32 to vector<32x128xf32>
      %c0_34 = arith.constant 0 : index
      %c0_35 = arith.constant 0 : index
      %50 = vector.load %arg9[%c0_34, %c0_35] : memref<32x128xf32, #tpu.memory_space<vmem>>, vector<32x128xf32>
      tpu.vector_store %arg9[%c0_34, %c0_35], %49 {strides = array<i32>} : memref<32x128xf32, #tpu.memory_space<vmem>>, vector<32x128xf32>,
    } else {
    }
    %c0 = arith.constant 0 : index
    %c0_1 = arith.constant 0 : index
    %3 = vector.load %arg4[%c0, %c0_1] : memref<32x128xi8, #tpu.memory_space<vmem>>, vector<32x128xi8>
    %4 = arith.sitofp %3 : vector<32x128xi8> to vector<32x128xf32>
    %c0_2 = arith.constant 0 : index
    %c0_3 = arith.constant 0 : index
    %5 = vector.load %arg2[%c0_2, %c0_3] : memref<32x1xf32, #tpu.memory_space<vmem>>, vector<32x1xf32>
    %c0_4 = arith.constant 0 : index
    %c0_5 = arith.constant 0 : index
    %6 = vector.load %arg3[%c0_4, %c0_5] : memref<1x128xf32, #tpu.memory_space<vmem>>, vector<1x128xf32>
    %7 = vector.broadcast %5 : vector<32x1xf32> to vector<32x128xf32>
    %8 = vector.broadcast %6 : vector<1x128xf32> to vector<32x128xf32>
    %9 = arith.addf %7, %8 : vector<32x128xf32>
    %cst = arith.constant 2.000000e-01 : f32
    %10 = vector.broadcast %cst : f32 to vector<32x128xf32>
    %11 = arith.mulf %10, %9 : vector<32x128xf32>
    %12 = arith.maximumf %9, %11 : vector<32x128xf32>
    %cst_6 = arith.constant 0.000000e+00 : f32
    %13 = vector.broadcast %cst_6 : f32 to vector<32x128xf32>
    %14 = arith.cmpf ogt, %4, %13 : vector<32x128xf32>
    %cst_7 = arith.constant -1.000000e+30 : f32
    %15 = vector.broadcast %cst_7 : f32 to vector<32x128xf32>
    %16 = arith.select %14, %12, %15 : vector<32x128xi1>, vector<32x128xf32>
    %c0_8 = arith.constant 0 : index
    %c0_9 = arith.constant 0 : index
    %17 = vector.load %arg7[%c0_8, %c0_9] : memref<32x1xf32, #tpu.memory_space<vmem>>, vector<32x1xf32>
    %cst_10 = arith.constant dense<0xFF800000> : vector<32xf32>
    %18 = vector.multi_reduction <maximumf>, %16, %cst_10 [1] : vector<32x128xf32> to vector<32xf32>
    %19 = vector.shape_cast %18 : vector<32xf32> to vector<32x1xf32>
    %20 = arith.maximumf %17, %19 : vector<32x1xf32>
    %21 = arith.subf %17, %20 : vector<32x1xf32>
    %22 = math.exp %21 : vector<32x1xf32>
    %23 = vector.broadcast %20 : vector<32x1xf32> to vector<32x128xf32>
    %24 = arith.subf %16, %23 : vector<32x128xf32>
    %25 = math.exp %24 : vector<32x128xf32>
    %26 = arith.mulf %25, %4 : vector<32x128xf32>
    %c0_11 = arith.constant 0 : index
    %c0_12 = arith.constant 0 : index
    %27 = vector.load %arg8[%c0_11, %c0_12] : memref<32x1xf32, #tpu.memory_space<vmem>>, vector<32x1xf32>
    %28 = arith.mulf %22, %27 : vector<32x1xf32>
    %cst_13 = arith.constant dense<0.000000e+00> : vector<32xf32>
    %29 = vector.multi_reduction <add>, %26, %cst_13 [1] : vector<32x128xf32> to vector<32xf32>
    %30 = vector.shape_cast %29 : vector<32xf32> to vector<32x1xf32>
    %31 = arith.addf %28, %30 : vector<32x1xf32>
    %c0_14 = arith.constant 0 : index
    %c0_15 = arith.constant 0 : index
    %32 = vector.load %arg8[%c0_14, %c0_15] : memref<32x1xf32, #tpu.memory_space<vmem>>, vector<32x1xf32>
    tpu.vector_store %arg8[%c0_14, %c0_15], %31 {strides = array<i32>} : memref<32x1xf32, #tpu.memory_space<vmem>>, vector<32x1xf32>,
    %33 = arith.truncf %26 : vector<32x128xf32> to vector<32x128xbf16>
    %c0_16 = arith.constant 0 : index
    %c0_17 = arith.constant 0 : index
    %34 = vector.load %arg5[%c0_16, %c0_17] : memref<128x128xbf16, #tpu.memory_space<vmem>>, vector<128x128xbf16>
    %cst_18 = arith.constant dense<0.000000e+00> : vector<32x128xf32>
    %35 = tpu.matmul %33, %34, %cst_18 {dimension_numbers = #tpu.dot_dimension_numbers<[1], [0], [0], [1], [0, 0, 1, 1], [], []>} : vector<32x128xbf16>, vector<128x128xbf16>, vector<32x128xf32> -> vector<32x128xf32>
    %c0_19 = arith.constant 0 : index
    %c0_20 = arith.constant 0 : index
    %36 = vector.load %arg9[%c0_19, %c0_20] : memref<32x128xf32, #tpu.memory_space<vmem>>, vector<32x128xf32>
    %37 = vector.broadcast %22 : vector<32x1xf32> to vector<32x128xf32>
    %38 = arith.mulf %37, %36 : vector<32x128xf32>
    %39 = arith.addf %38, %35 : vector<32x128xf32>
    %c0_21 = arith.constant 0 : index
    %c0_22 = arith.constant 0 : index
    %40 = vector.load %arg9[%c0_21, %c0_22] : memref<32x128xf32, #tpu.memory_space<vmem>>, vector<32x128xf32>
    tpu.vector_store %arg9[%c0_21, %c0_22], %39 {strides = array<i32>} : memref<32x128xf32, #tpu.memory_space<vmem>>, vector<32x128xf32>,
    %c0_23 = arith.constant 0 : index
    %c0_24 = arith.constant 0 : index
    %41 = vector.load %arg7[%c0_23, %c0_24] : memref<32x1xf32, #tpu.memory_space<vmem>>, vector<32x1xf32>
    tpu.vector_store %arg7[%c0_23, %c0_24], %20 {strides = array<i32>} : memref<32x1xf32, #tpu.memory_space<vmem>>, vector<32x1xf32>,
    %c0_i32_25 = arith.constant 0 : i32
    %42 = arith.cmpi eq, %arg1, %c0_i32_25 : i32
    %43 = arith.extui %42 : i1 to i32
    %c0_i32_26 = arith.constant 0 : i32
    %44 = arith.cmpi ne, %43, %c0_i32_26 : i32
    scf.if %44 {
      %c0_27 = arith.constant 0 : index
      %c0_28 = arith.constant 0 : index
      %45 = vector.load %arg8[%c0_27, %c0_28] : memref<32x1xf32, #tpu.memory_space<vmem>>, vector<32x1xf32>
      %cst_29 = arith.constant 0.000000e+00 : f32
      %46 = vector.broadcast %cst_29 : f32 to vector<32x1xf32>
      %47 = arith.cmpf ogt, %45, %46 : vector<32x1xf32>
      %cst_30 = arith.constant 1.000000e+00 : f32
      %48 = vector.broadcast %cst_30 : f32 to vector<32x1xf32>
      %49 = arith.divf %48, %45 : vector<32x1xf32>
      %cst_31 = arith.constant 0.000000e+00 : f32
      %50 = vector.broadcast %cst_31 : f32 to vector<32x1xf32>
      %51 = arith.select %47, %49, %50 : vector<32x1xi1>, vector<32x1xf32>
      %c0_32 = arith.constant 0 : index
      %c0_33 = arith.constant 0 : index
      %52 = vector.load %arg9[%c0_32, %c0_33] : memref<32x128xf32, #tpu.memory_space<vmem>>, vector<32x128xf32>
      %53 = vector.broadcast %51 : vector<32x1xf32> to vector<32x128xf32>
      %54 = arith.mulf %52, %53 : vector<32x128xf32>
      %cst_34 = arith.constant 0.000000e+00 : f32
      %55 = vector.broadcast %cst_34 : f32 to vector<32x128xf32>
      %56 = arith.cmpf ogt, %54, %55 : vector<32x128xf32>
      %57 = math.exp %54 : vector<32x128xf32>
      %cst_35 = arith.constant 1.000000e+00 : f32
      %58 = vector.broadcast %cst_35 : f32 to vector<32x128xf32>
      %59 = arith.subf %57, %58 : vector<32x128xf32>
      %60 = arith.select %56, %54, %59 : vector<32x128xi1>, vector<32x128xf32>
      %c0_36 = arith.constant 0 : index
      %c0_37 = arith.constant 0 : index
      %61 = vector.load %arg6[%c0_36, %c0_37] : memref<32x128xf32, #tpu.memory_space<vmem>>, vector<32x128xf32>
      tpu.vector_store %arg6[%c0_36, %c0_37], %60 {strides = array<i32>} : memref<32x128xf32, #tpu.memory_space<vmem>>, vector<32x128xf32>,
    } else {
    }
    return
  }
  func.func @transform_0(%arg0: i32, %arg1: i32) -> (i32, i32) {
    %c0_i32 = arith.constant 0 : i32
    %c0_i32_0 = arith.constant 0 : i32
    return %arg0, %c0_i32 : i32, i32
  }
  func.func @transform_1(%arg0: i32, %arg1: i32) -> (i32, i32) {
    %c0_i32 = arith.constant 0 : i32
    %c0_i32_0 = arith.constant 0 : i32
    return %c0_i32, %arg1 : i32, i32
  }
  func.func @transform_2(%arg0: i32, %arg1: i32) -> (i32, i32) {
    %c0_i32 = arith.constant 0 : i32
    return %arg0, %arg1 : i32, i32
  }
  func.func @transform_3(%arg0: i32, %arg1: i32) -> (i32, i32) {
    %c0_i32 = arith.constant 0 : i32
    %c0_i32_0 = arith.constant 0 : i32
    return %arg1, %c0_i32 : i32, i32
  }
  func.func @transform_4(%arg0: i32, %arg1: i32) -> (i32, i32) {
    %c0_i32 = arith.constant 0 : i32
    %c0_i32_0 = arith.constant 0 : i32
    return %arg0, %c0_i32 : i32, i32
  }
}

</mosaic_0001>

<bundles_post_ra>
// kernel: tpu_custom_call.1
= control target key start
LH: loop header
LB: loop body
LE: loop exit
PB: predicated region body
PF: predicated region fallthrough
CT: control target
= control target key end

     0   :  { %9 = vsyncpa [#allocation6], 0  ;;  %s749_s0 = inlined_call_operand.vmem [shape: f32[32,1], index: 0, kind: input, shape index: {}]   ;;  %s750_s1 = inlined_call_operand.vmem [shape: f32[1,128], index: 1, kind: input, shape index: {}]   ;;  %s751_s2 = inlined_call_operand.vmem [shape: s8[32,128], index: 2, kind: input, shape index: {}]   ;;  %s752_s3 = inlined_call_operand.hbm [shape: bf16[128,128], index: 3, kind: input, shape index: {}]   ;;  %s753_s4 = inlined_call_operand.hbm [shape: f32[32,128], index: 4, kind: output, shape index: {}]  }
   0x1   :  { %10 = vsyncpa [#allocation7], 0  ;;  %s588_s15 = smov [#allocation5]   ;;  %s540_s19 = scalar_lea.hbm %s752_s3, 1024 }
   0x2   :  { %s22_s16 = sshll.u32 %s588_s15, 4  ;;  %p541_p0 = scmp.ne.s32.totalorder %s752_s3, %s540_s19  ;;  %s23_s16 = int_to_ptr.vmem [resolvable:$true] %s22_s16 }
   0x3   :  { %p544_p1 = scmp.lt.u32.totalorder %s540_s19, %s752_s3 }
   0x5   :  { %p546_p2 = pnand %p544_p1, %p541_p0 }
   0x7   :  { %549 = shalt.err (!%p546_p2)
}
   0x8   :  { %s550_s24 = scalar_lea.vmem %s23_s16, 1024  ;;  %p555_p4 = scmp.lt.s32.totalorder %s23_s16, %s23_s16 }
   0x9   :  { %p551_p3 = scmp.ne.s32.totalorder %s23_s16, %s550_s24  ;;  %p556_p5 = scmp.lt.s32.totalorder %s550_s24, %s550_s24 }
   0xb   :  { %p557_p6 = por %p556_p5, %p555_p4 }
   0xd   :  { %p558_p7 = pnand %p557_p6, %p551_p3 }
   0xf   :  { %561 = shalt.err (!%p558_p7)
}
  0x10   :  { %s589_s25 = smov 64   ;;  %s590_s26 = smov 4  }
  0x11   :  { %28 = dma.hbm_to_vmem [thread:$0]  %s752_s3, 1024, %s23_s16, [#allocation6], %s589_s25, %s589_s25, %s590_s26  }
  0x12   :  { %584 = dma.done.wait [#allocation6], 1024  }
  0x13   :  { %585 = vsyncadd [#allocation6], 4294966272  ;;  %v591_v0 = vmov 0   ;;  %v61_v1 = vld [vmem:[%s749_s0 + $0x10] sm:$0xff]  ;;  %v59_v2 = vld [vmem:[%s749_s0] sm:$0xff]  ;;  %vm37_vm0 = vcmask 7168  }
  0x14   :  { %499 = vset.pattern.permute.xlu1 %v591_v0  ;;  %498 = vset.pattern.permute.xlu0 %v591_v0  ;;  %v62_v3 = vld [vmem:[%s749_s0 + $0x18] sm:$0xff]  ;;  %v60_v4 = vld [vmem:[%s749_s0 + $0x8] sm:$0xff]  ;;  %v592_v5 = vmov -1e+30   ;;  %v50_v6 = vld [vmem:[%s751_s2] sm:$0xff]  ;;  %v593_v36 = vmov 0.0  }
  0x15   :  { %76 = vperm.xlu1 %499, %v61_v1   ;;  %66 = vperm.xlu0 %498, %v59_v2   ;;  %38 = vst.msk [vmem:[#allocation2] sm:$0xff] %vm37_vm0, %v592_v5  ;;  %39 = vst.msk [vmem:[#allocation2 + $0x8] sm:$0xff] %vm37_vm0, %v592_v5  ;;  %v51_v7 = vunpack.c.0.s8 %v50_v6  ;;  %v446_v8 = vld [vmem:[%s750_s1] ss:$0 sm:$0xff]  ;;  %v52_v12 = vunpack.c.1.s8 %v50_v6  ;;  %v53_v13 = vunpack.c.2.s8 %v50_v6  ;;  %v54_v22 = vunpack.c.3.s8 %v50_v6  ;;  %v500_v37 = vld [vmem:[#allocation5] sm:$0xff]   ;;  %s594_s0 = smov [#allocation8]  }
  0x16   :  { %40 = vst.msk [vmem:[#allocation2 + $0x10] sm:$0xff] %vm37_vm0, %v592_v5  ;;  %41 = vst.msk [vmem:[#allocation2 + $0x18] sm:$0xff] %vm37_vm0, %v592_v5  ;;  %v501_v38 = vld [vmem:[#allocation5 + $0x8] sm:$0xff]   ;;  %469 = vmatprep.subr.bf16.mxu0 %v500_v37  ;;  %v502_v49 = vld [vmem:[#allocation5 + $0x10] sm:$0xff]   ;;  %s434_s1 = sshll.u32 %s594_s0, 4  ;;  %s435_s1 = int_to_ptr.vmem [resolvable:$true] %s434_s1 }
  0x17   :  { %v656_v11 = vcvt.s32.f32 %v51_v7  ;;  %v659_v20 = vcvt.s32.f32 %v52_v12  ;;  %v661_v21 = vcvt.s32.f32 %v53_v13  ;;  %v668_v30 = vcvt.s32.f32 %v54_v22  ;;  %42 = vst.msk [vmem:[#allocation3] sm:$0xff] %vm37_vm0, %v593_v36  ;;  %43 = vst.msk [vmem:[#allocation3 + $0x8] sm:$0xff] %vm37_vm0, %v593_v36  ;;  %470 = vmatpush3.bf16.msra.mxu0 %v500_v37  ;;  %v503_v55 = vld [vmem:[#allocation5 + $0x18] sm:$0xff]   ;;  %v504_v57 = vld [vmem:[#allocation5 + $0x20] sm:$0xff]   ;;  %s562_s2 = scalar_lea.vmem %s435_s1, 512  ;;  %p567_p9 = scmp.lt.s32.totalorder %s435_s1, %s435_s1 }
  0x18   :  { %44 = vst.msk [vmem:[#allocation3 + $0x10] sm:$0xff] %vm37_vm0, %v593_v36  ;;  %45 = vst.msk [vmem:[#allocation3 + $0x18] sm:$0xff] %vm37_vm0, %v593_v36  ;;  %471 = vmatprep.subr.bf16.mxu0 %v501_v38  ;;  %v505_v58 = vld [vmem:[#allocation5 + $0x28] sm:$0xff]   ;;  %v506_v59 = vld [vmem:[#allocation5 + $0x30] sm:$0xff]   ;;  %p563_p8 = scmp.ne.s32.totalorder %s435_s1, %s562_s2  ;;  %p568_p10 = scmp.lt.s32.totalorder %s562_s2, %s562_s2 }
  0x19   :  { %81 = vperm.xlu1 %499, %v62_v3   ;;  %71 = vperm.xlu0 %498, %v60_v4   ;;  %vm102_vm1 = vcmp.gt.f32.partialorder %v656_v11, 0.0  ;;  %vm103_vm2 = vcmp.gt.f32.partialorder %v659_v20, 0.0  ;;  %vm104_vm3 = vcmp.gt.f32.partialorder %v661_v21, 0.0  ;;  %vm105_vm4 = vcmp.gt.f32.partialorder %v668_v30, 0.0  ;;  %v507_v60 = vld [vmem:[#allocation5 + $0x38] sm:$0xff]  }
  0x1a   :  { %p569_p11 = por %p568_p10, %p567_p9 }
  0x1b   :  { %472 = vmatpush3.bf16.msra.mxu0 %v501_v38 }
  0x1c   :  { %v684_v39 = vld [vmem:[#allocation2] sm:$0xff]  ;;  %v689_v42 = vld [vmem:[#allocation2 + $0x8] sm:$0xff]  ;;  %473 = vmatprep.subr.bf16.mxu0 %v502_v49  ;;  %p570_p12 = pnand %p569_p11, %p563_p8 }
  0x1d   :  { %v691_v43 = vld [vmem:[#allocation2 + $0x10] sm:$0xff]  ;;  %v704_v50 = vld [vmem:[#allocation2 + $0x18] sm:$0xff] }
  0x1f   :  { %474 = vmatpush3.bf16.msra.mxu0 %v502_v49  ;;  %v177_v38 = vld [vmem:[#allocation3 + $0x18] sm:$0xff] }
  0x20   :  { %475 = vmatprep.subr.bf16.mxu0 %v503_v55 }
  0x23   :  { %476 = vmatpush3.bf16.msra.mxu0 %v503_v55 }
  0x24   :  { %477 = vmatprep.subr.bf16.mxu0 %v504_v57 }
  0x27   :  { %478 = vmatpush3.bf16.msra.mxu0 %v504_v57 }
  0x28   :  { %479 = vmatprep.subr.bf16.mxu0 %v505_v58 }
  0x2b   :  { %480 = vmatpush3.bf16.msra.mxu0 %v505_v58 }
  0x2c   :  { %481 = vmatprep.subr.bf16.mxu0 %v506_v59 }
  0x2f   :  { %482 = vmatpush3.bf16.msra.mxu0 %v506_v59 }
  0x30   :  { %483 = vmatprep.subr.bf16.mxu0 %v507_v60 }
  0x33   :  { %484 = vmatpush3.bf16.msra.mxu0 %v507_v60 }
  0x94   :  { %v77_v9 = vpop.permute.xlu1 %76  ;;  %v67_v10 = vpop.permute.xlu0 %66 }
  0x95   :  { %v92_v14 = vadd.f32 %v446_v8, %v77_v9  ;;  %v90_v15 = vadd.f32 %v446_v8, %v67_v10 }
  0x97   :  { %v96_v16 = vmul.f32 0.2, %v92_v14  ;;  %v94_v17 = vmul.f32 0.2, %v90_v15 }
  0x98   :  { %v82_v18 = vpop.permute.xlu1 %81  ;;  %v72_v19 = vpop.permute.xlu0 %71 }
  0x99   :  { %v93_v23 = vadd.f32 %v446_v8, %v82_v18  ;;  %v91_v24 = vadd.f32 %v446_v8, %v72_v19  ;;  %v98_v25 = vmax.f32 %v90_v15, %v94_v17  ;;  %v100_v29 = vmax.f32 %v92_v14, %v96_v16 }
  0x9b   :  { %v97_v26 = vmul.f32 0.2, %v93_v23  ;;  %v95_v27 = vmul.f32 0.2, %v91_v24  ;;  %v663_v28 = vsel %vm102_vm1, %v98_v25, -1e+30 }
  0x9c   :  { %114 = vmax.xlane.f32.xlu0 %v663_v28  ;;  %v672_v33 = vsel %vm104_vm3, %v100_v29, -1e+30 }
  0x9d   :  { %v99_v31 = vmax.f32 %v91_v24, %v95_v27  ;;  %v101_v34 = vmax.f32 %v93_v23, %v97_v26  ;;  %v174_v27 = vld [vmem:[#allocation3] sm:$0xff] }
  0x9f   :  { %v670_v32 = vsel %vm103_vm2, %v99_v31, -1e+30  ;;  %v677_v35 = vsel %vm105_vm4, %v101_v34, -1e+30 }
  0xa0   :  { %116 = vmax.xlane.f32.xlu1 %v670_v32  ;;  %118 = vmax.xlane.f32.xlu0 %v672_v33 }
  0xa4   :  { %120 = vmax.xlane.f32.xlu0 %v677_v35 }
 0x129   :  { %v115_v40 = vpop.xlane.xlu0 %114 }
 0x12a   :  { %v687_v41 = vmax.f32 %v684_v39, %v115_v40 }
 0x12c   :  { %v126_v44 = vsub.f32 %v684_v39, %v687_v41  ;;  %350 = vst.msk [vmem:[#allocation2] sm:$0xff] %vm37_vm0, %v687_v41  ;;  %140 = vperm.xlu1 %499, %v687_v41  }
 0x12d   :  { %v117_v45 = vpop.xlane.xlu1 %116  ;;  %v119_v46 = vpop.xlane.xlu0 %118 }
 0x12e   :  { %v699_v47 = vmax.f32 %v689_v42, %v117_v45  ;;  %v702_v48 = vmax.f32 %v691_v43, %v119_v46  ;;  %v130_v18 = vmul.f32 1.442695, %v126_v44 }
 0x130   :  { %v127_v51 = vsub.f32 %v689_v42, %v699_v47  ;;  %351 = vst.msk [vmem:[#allocation2 + $0x8] sm:$0xff] %vm37_vm0, %v699_v47  ;;  %v128_v52 = vsub.f32 %v691_v43, %v702_v48  ;;  %352 = vst.msk [vmem:[#allocation2 + $0x10] sm:$0xff] %vm37_vm0, %v702_v48  ;;  %145 = vperm.xlu0 %498, %v699_v47   ;;  %150 = vperm.xlu1 %499, %v702_v48  }
 0x131   :  { %v121_v53 = vpop.xlane.xlu0 %120 }
 0x132   :  { %v125_v54 = vmax.f32 %v704_v50, %v121_v53 }
 0x134   :  { %v129_v56 = vsub.f32 %v704_v50, %v125_v54  ;;  %353 = vst.msk [vmem:[#allocation2 + $0x18] sm:$0xff] %vm37_vm0, %v125_v54  ;;  %155 = vperm.xlu1 %499, %v125_v54  }
 0x1ab   :  { %v141_v61 = vpop.permute.xlu1 %140 }
 0x1ac   :  { %v158_v62 = vsub.f32 %v663_v28, %v141_v61 }
 0x1ae   :  { %v162_v63 = vmul.f32 1.442695, %v158_v62 }
 0x1af   :  { %v146_v0 = vpop.permute.xlu0 %145  ;;  %v151_v1 = vpop.permute.xlu1 %150 }
 0x1b0   :  { %508 = vpow2.f32 %v162_v63  ;;  %v159_v2 = vsub.f32 %v670_v32, %v146_v0  ;;  %v160_v3 = vsub.f32 %v672_v33, %v151_v1  ;;  %v176_v32 = vld [vmem:[#allocation3 + $0x10] sm:$0xff] }
 0x1b2   :  { %v164_v4 = vmul.f32 1.442695, %v159_v2  ;;  %v166_v5 = vmul.f32 1.442695, %v160_v3 }
 0x1b3   :  { %v156_v6 = vpop.permute.xlu1 %155 }
 0x1b4   :  { %510 = vpow2.f32 %v164_v4  ;;  %v161_v7 = vsub.f32 %v677_v35, %v156_v6 }
 0x1b5   :  { %512 = vpow2.f32 %v166_v5 }
 0x1b6   :  { %v168_v8 = vmul.f32 1.442695, %v161_v7 }
 0x1b8   :  { %514 = vpow2.f32 %v168_v8 }
 0x1b9   :  { %516 = vpow2.f32 %v130_v18 }
 0x1ba   :  { %v509_v9 = vpop.eup %508 }
 0x1bb   :  { %v170_v10 = vmul.f32 %v509_v9, %v656_v11  ;;  %v134_v11 = vmul.f32 1.442695, %v128_v52 }
 0x1bd   :  { %182 = vadd.xlane.f32.xlu0 %v170_v10  ;;  %518 = vpow2.f32 %v134_v11 }
 0x1be   :  { %v511_v12 = vpop.eup %510 }
 0x1bf   :  { %v513_v13 = vpop.eup %512  ;;  %v171_v14 = vmul.f32 %v511_v12, %v659_v20  ;;  %v136_v20 = vmul.f32 1.442695, %v129_v56 }
 0x1c0   :  { %v172_v15 = vmul.f32 %v513_v13, %v661_v21  ;;  %v132_v21 = vmul.f32 1.442695, %v127_v51 }
 0x1c1   :  { %184 = vadd.xlane.f32.xlu1 %v171_v14  ;;  %v199_v16 = vpack.c.bf16 %v171_v14, %v170_v10  ;;  %520 = vpow2.f32 %v136_v20 }
 0x1c2   :  { %v515_v17 = vpop.eup %514  ;;  %186 = vadd.xlane.f32.xlu0 %v172_v15  ;;  %522 = vpow2.f32 %v132_v21 }
 0x1c3   :  { %485 = vmatprep.mubr.bf16.mxu0 %v199_v16  ;;  %v173_v19 = vmul.f32 %v515_v17, %v668_v30  ;;  %v517_v23 = vpop.eup %516  ;;  %v175_v30 = vld [vmem:[#allocation3 + $0x8] sm:$0xff] }
 0x1c4   :  { %v178_v28 = vmul.f32 %v517_v23, %v174_v27 }
 0x1c5   :  { %v200_v22 = vpack.c.bf16 %v173_v19, %v172_v15 }
 0x1c6   :  { %188 = vadd.xlane.f32.xlu0 %v173_v19 }
 0x1c7   :  { %486 = vmatmul.mubr.bf16.vlgmr.msra.gmra.mrb[0].mxu0 %v200_v22  ;;  %v519_v24 = vpop.eup %518 }
 0x1c8   :  { %v180_v34 = vmul.f32 %v519_v24, %v176_v32 }
 0x1cb   :  { %v521_v25 = vpop.eup %520 }
 0x1cc   :  { %v523_v26 = vpop.eup %522  ;;  %v181_v40 = vmul.f32 %v521_v25, %v177_v38 }
 0x1cd   :  { %v179_v33 = vmul.f32 %v523_v26, %v175_v30 }
 0x1d2   :  { %320 = vperm.xlu1 %499, %v517_v23  }
 0x1d6   :  { %330 = vperm.xlu1 %499, %v519_v24  }
 0x1da   :  { %335 = vperm.xlu1 %499, %v521_v25  }
 0x1dc   :  { %325 = vperm.xlu0 %498, %v523_v26  }
 0x24a   :  { %v183_v29 = vpop.xlane.xlu0 %182 }
 0x24b   :  { %v190_v31 = vadd.f32 %v183_v29, %v178_v28 }
 0x24d   :  { %195 = vst.msk [vmem:[#allocation3] sm:$0xff] %vm37_vm0, %v190_v31 }
 0x24e   :  { %v185_v35 = vpop.xlane.xlu1 %184 }
 0x24f   :  { %v187_v36 = vpop.xlane.xlu0 %186  ;;  %v191_v37 = vadd.f32 %v185_v35, %v179_v33 }
 0x250   :  { %v192_v39 = vadd.f32 %v187_v36, %v180_v34 }
 0x251   :  { %196 = vst.msk [vmem:[#allocation3 + $0x8] sm:$0xff] %vm37_vm0, %v191_v37 }
 0x252   :  { %197 = vst.msk [vmem:[#allocation3 + $0x10] sm:$0xff] %vm37_vm0, %v192_v39  ;;  %v321_v59 = vpop.permute.xlu1 %320 }
 0x253   :  { %v189_v41 = vpop.xlane.xlu0 %188  ;;  %v338_v62 = vmul.f32 0.0, %v321_v59 }
 0x254   :  { %v193_v42 = vadd.f32 %v189_v41, %v181_v40  ;;  %v357_v43 = vld [vmem:[#allocation3] sm:$0xff] }
 0x255   :  { %524 = vrcp.f32 %v357_v43  ;;  %vm361_vm5 = vcmp.gt.f32.partialorder %v357_v43, 0.0 }
 0x256   :  { %198 = vst.msk [vmem:[#allocation3 + $0x18] sm:$0xff] %vm37_vm0, %v193_v42  ;;  %v331_v60 = vpop.permute.xlu1 %330 }
 0x257   :  { %v340_v4 = vmul.f32 0.0, %v331_v60 }
 0x258   :  { %v358_v44 = vld [vmem:[#allocation3 + $0x8] sm:$0xff] }
 0x259   :  { %526 = vrcp.f32 %v358_v44  ;;  %v359_v45 = vld [vmem:[#allocation3 + $0x10] sm:$0xff]  ;;  %vm362_vm6 = vcmp.gt.f32.partialorder %v358_v44, 0.0 }
 0x25a   :  { %528 = vrcp.f32 %v359_v45  ;;  %vm363_vm7 = vcmp.gt.f32.partialorder %v359_v45, 0.0  ;;  %v336_v0 = vpop.permute.xlu1 %335 }
 0x25b   :  { %v326_v61 = vpop.permute.xlu0 %325  ;;  %v341_v12 = vmul.f32 0.0, %v336_v0 }
 0x25c   :  { %v339_v2 = vmul.f32 0.0, %v326_v61 }
 0x25d   :  { %v360_v46 = vld [vmem:[#allocation3 + $0x18] sm:$0xff] }
 0x25e   :  { %530 = vrcp.f32 %v360_v46  ;;  %vm364_vm8 = vcmp.gt.f32.partialorder %v360_v46, 0.0 }
 0x25f   :  { %v525_v47 = vpop.eup %524 }
 0x260   :  { %v373_v48 = vsel %vm361_vm5, %v525_v47, 0.0 }
 0x261   :  { %383 = vperm.xlu0 %498, %v373_v48  }
 0x263   :  { %v527_v49 = vpop.eup %526 }
 0x264   :  { %v529_v50 = vpop.eup %528  ;;  %v374_v51 = vsel %vm362_vm6, %v527_v49, 0.0 }
 0x265   :  { %388 = vperm.xlu1 %499, %v374_v51   ;;  %v375_v52 = vsel %vm363_vm7, %v529_v50, 0.0 }
 0x266   :  { %393 = vperm.xlu0 %498, %v375_v52  }
 0x268   :  { %v531_v53 = vpop.eup %530 }
 0x269   :  { %v376_v54 = vsel %vm364_vm8, %v531_v53, 0.0 }
 0x26a   :  { %398 = vperm.xlu1 %499, %v376_v54  }
 0x29a   :  { %v487_v55 = vpop.f32.mrb[0].mxu0 }
 0x29b   :  { %v299_v56 = vpop.f32.mrb[1].mxu0  ;;  %v344_v7 = vadd.f32 %v487_v55, %v340_v4 }
 0x29c   :  { %v488_v57 = vpop.f32.mrb[2].mxu0  ;;  %v342_v63 = vadd.f32 %v338_v62, %v299_v56 }
 0x29d   :  { %v302_v58 = vpop.f32.mrb[3].mxu0  ;;  %v345_v15 = vadd.f32 %v488_v57, %v341_v12 }
 0x29e   :  { %v343_v5 = vadd.f32 %v339_v2, %v302_v58 }
 0x2e0   :  { %v384_v1 = vpop.permute.xlu0 %383 }
 0x2e1   :  { %v401_v3 = vmul.f32 %v384_v1, %v342_v63 }
 0x2e3   :  { %v409_v6 = vmul.f32 1.442695, %v401_v3  ;;  %vm405_vm9 = vcmp.gt.f32.partialorder %v401_v3, 0.0 }
 0x2e4   :  { %v389_v8 = vpop.permute.xlu1 %388 }
 0x2e5   :  { %532 = vpow2.f32 %v409_v6  ;;  %v402_v9 = vmul.f32 %v389_v8, %v343_v5  ;;  %v394_v10 = vpop.permute.xlu0 %393 }
 0x2e6   :  { %v403_v13 = vmul.f32 %v394_v10, %v344_v7 }
 0x2e7   :  { %v411_v14 = vmul.f32 1.442695, %v402_v9  ;;  %vm406_vm10 = vcmp.gt.f32.partialorder %v402_v9, 0.0 }
 0x2e8   :  { %v413_v16 = vmul.f32 1.442695, %v403_v13  ;;  %vm407_vm11 = vcmp.gt.f32.partialorder %v403_v13, 0.0 }
 0x2e9   :  { %534 = vpow2.f32 %v411_v14  ;;  %v399_v17 = vpop.permute.xlu1 %398 }
 0x2ea   :  { %536 = vpow2.f32 %v413_v16  ;;  %v404_v18 = vmul.f32 %v399_v17, %v345_v15 }
 0x2ec   :  { %v415_v19 = vmul.f32 1.442695, %v404_v18  ;;  %vm408_vm12 = vcmp.gt.f32.partialorder %v404_v18, 0.0 }
 0x2ee   :  { %538 = vpow2.f32 %v415_v19 }
 0x2ef   :  { %v533_v22 = vpop.eup %532 }
 0x2f0   :  { %v455_v11 = vadd.f32 -1.0, %v533_v22 }
 0x2f2   :  { %v421_v20 = vsel %vm405_vm9, %v401_v3, %v455_v11 }
 0x2f3   :  { %v535_v21 = vpop.eup %534  ;;  %425 = vst [vmem:[#allocation8] sm:$0xff] %v421_v20 }
 0x2f4   :  { %v537_v23 = vpop.eup %536  ;;  %v456_v24 = vadd.f32 -1.0, %v535_v21 }
 0x2f5   :  { %v457_v25 = vadd.f32 -1.0, %v537_v23 }
 0x2f6   :  { %v422_v26 = vsel %vm406_vm10, %v402_v9, %v456_v24 }
 0x2f7   :  { %426 = vst [vmem:[#allocation8 + $0x8] sm:$0xff] %v422_v26  ;;  %v423_v27 = vsel %vm407_vm11, %v403_v13, %v457_v25 }
 0x2f8   :  { %v539_v28 = vpop.eup %538  ;;  %427 = vst [vmem:[#allocation8 + $0x10] sm:$0xff] %v423_v27 }
 0x2f9   :  { %v458_v29 = vadd.f32 -1.0, %v539_v28 }
 0x2fb   :  { %v424_v30 = vsel %vm408_vm12, %v404_v18, %v458_v29 }
 0x2fc   :  { %428 = vst [vmem:[#allocation8 + $0x18] sm:$0xff] %v424_v30 }
 0x2fd   :  { %573 = shalt.err (!%p570_p12)
}
 0x2fe   :  { %s574_s16 = scalar_lea.hbm %s753_s4, 512 }
 0x2ff   :  { %p575_p13 = scmp.ne.s32.totalorder %s753_s4, %s574_s16  ;;  %p578_p0 = scmp.lt.u32.totalorder %s574_s16, %s753_s4 }
 0x301   :  { %p580_p1 = pnand %p578_p0, %p575_p13 }
 0x303   :  { %583 = shalt.err (!%p580_p1)
}
 0x304   :  { %s595_s21 = smov 128   ;;  %s596_s22 = smov 8  }
 0x305   :  { %440 = dma.vmem_to_hbm [thread:$0]  %s435_s1, 512, %s753_s4, [#allocation7], %s595_s21, %s595_s21, %s596_s22  }
 0x306   :  { %586 = dma.done.wait [#allocation7], 512  }
 0x307   :  { %587 = vsyncadd [#allocation7], 4294966784 }
 0x308   :  { %444 = vsyncpa [#allocation6], 1 }
 0x309   :  { %445 = vsyncpa [#allocation7], 1 }

</bundles_post_ra>
